<compile_context>
chip_gen: v7x
topology: tpu7x:2x2x1
jax: 0.10.0
libtpu: 0.0.40
codegen_flags: <defaults>
</compile_context>

<pallas_src>
import jax
import jax.numpy as jnp
from jax import lax
from jax.experimental import pallas as pl
from jax.experimental.pallas import tpu as pltpu  # noqa: F401  (TPU backend)

BN_EPS = 1e-5
# Set to jnp.bfloat16 on v6e/v7x for ~2x MXU throughput and half the input DMA
# bytes (requires a looser verification tolerance); f32 keeps exact parity
# with the f32 PyTorch module, so it is used for the correctness check here.
MXU_DTYPE = jnp.float32


# ---------------------------------------------------------------------------
# Fused kernel: 3x3 conv (banded matmuls) + bias + BatchNorm (batch stats) + ReLU
# ---------------------------------------------------------------------------
def fused_conv_bn_relu_kernel(x2_ref, bw_ref, bias_ref, gamma_ref, beta_ref,
                              sel_ref, selt_ref, o_ref):
    # x2_ref  : (N, H+2, W*Cin)    H-padded input, (w, ci) packed on lanes
    # bw_ref  : (3, W*Cin, W*Cout) banded weights (kw taps + W padding folded in)
    # bias_ref: (1, W*Cout)        conv bias tiled over w
    # gamma_ref, beta_ref: (1, Cout)
    # sel_ref : (W*Cout, Cout)     lane -> channel reduction selector
    # selt_ref: (Cout, W*Cout)     channel -> lane broadcast selector
    # o_ref   : (N*H, W*Cout)      lane-dense fused output
    N, Hp, WCin = x2_ref.shape
    H = Hp - 2
    NH, WCout = o_ref.shape
    Cout = sel_ref.shape[1]
    W = WCout // Cout

    x2 = x2_ref[...].astype(MXU_DTYPE)                         # (N, H+2, W*Cin)

    # --- convolution: 3 accumulating banded matmuls (one per kh tap) --------
    acc = jnp.zeros((NH, WCout), jnp.float32)
    for kh in range(3):                                        # static unroll
        rows = x2[:, kh:kh + H, :].reshape(NH, WCin)           # (N*H, W*Cin)
        acc = acc + jnp.dot(rows, bw_ref[kh].astype(MXU_DTYPE),
                            preferred_element_type=jnp.float32)
    conv = acc + bias_ref[...]                                 # (N*H, W*Cout)

    # --- BatchNorm2d (training-mode biased batch stats over N, H, W) -------
    cnt_inv = 1.0 / float(NH * W)
    colsum = jnp.sum(conv, axis=0, keepdims=True)              # (1, W*Cout)
    mean_c = jnp.dot(colsum, sel_ref[...],
                     preferred_element_type=jnp.float32) * cnt_inv   # (1, Cout)
    mean_l = jnp.dot(mean_c, selt_ref[...],
                     preferred_element_type=jnp.float32)       # (1, W*Cout)
    centered = conv - mean_l
    sqsum = jnp.sum(centered * centered, axis=0, keepdims=True)
    var_c = jnp.dot(sqsum, sel_ref[...],
                    preferred_element_type=jnp.float32) * cnt_inv    # (1, Cout)
    inv_c = lax.rsqrt(var_c + BN_EPS)                          # (1, Cout)

    scale_c = gamma_ref[...] * inv_c                           # (1, Cout)
    shift_c = beta_ref[...] - mean_c * scale_c                 # (1, Cout)
    scale_l = jnp.dot(scale_c, selt_ref[...],
                      preferred_element_type=jnp.float32)      # (1, W*Cout)
    shift_l = jnp.dot(shift_c, selt_ref[...],
                      preferred_element_type=jnp.float32)      # (1, W*Cout)

    y = jnp.maximum(conv * scale_l + shift_l, 0.0)             # BN affine + ReLU
    o_ref[...] = y.astype(o_ref.dtype)                         # full-lane stores


# ---------------------------------------------------------------------------
# Wrapper
# ---------------------------------------------------------------------------
def single_conv_forward(x_nchw, weight, bias, gamma, beta):
    """x_nchw: (N, Cin, H, W); weight: (Cout, Cin, 3, 3); bias/gamma/beta: (Cout,)."""
    N, Cin, H, W = x_nchw.shape
    Cout = weight.shape[0]

    # NCHW -> NHWC; pad H only (the W-direction "same" padding is folded into
    # the banded weight matrix, avoiding a full-width jnp.pad pass).
    x_nhwc = jnp.transpose(x_nchw, (0, 2, 3, 1))
    x_padh = jnp.pad(x_nhwc, ((0, 0), (1, 1), (0, 0), (0, 0)))
    x2 = x_padh.reshape(N, H + 2, W * Cin)

    # Banded weights: bw[kh, wsrc*Cin+ci, w*Cout+co] = weight[co, ci, kh, kw]
    # where wsrc = w + kw - 1 (terms with wsrc outside [0, W) are zero ==
    # implicit zero padding along W).
    wt = jnp.transpose(weight, (2, 3, 1, 0)).astype(MXU_DTYPE)        # (3,3,Cin,Cout)
    band = (jnp.arange(W)[None, None, :] ==
            (jnp.arange(W)[None, :, None] + jnp.arange(3)[:, None, None] - 1)
            ).astype(MXU_DTYPE)                                       # (kw, w, wsrc)
    bw = jnp.einsum('kws,hkio->hsiwo', band, wt).reshape(3, W * Cin, W * Cout)

    bias_l = jnp.tile(bias.astype(jnp.float32), (W,)).reshape(1, W * Cout)
    sel = jnp.tile(jnp.eye(Cout, dtype=jnp.float32), (W, 1))          # (W*Cout, Cout)
    selt = jnp.transpose(sel)                                         # (Cout, W*Cout)

    # Single fused pallas_call, whole (toy-sized) problem as one step: every
    # operand is a full-array VMEM block; output is a lane-dense (N*H, W*Cout)
    # slab (32 x 128 here -> unmasked vector stores).
    out_flat = pl.pallas_call(
        fused_conv_bn_relu_kernel,
        out_shape=jax.ShapeDtypeStruct((N * H, W * Cout), jnp.float32),
    )(x2, bw, bias_l,
      gamma.reshape(1, Cout).astype(jnp.float32),
      beta.reshape(1, Cout).astype(jnp.float32),
      sel, selt)

    # (N*H, W*Cout) -> NCHW to match the PyTorch output layout.
    return out_flat.reshape(N, H, W, Cout).transpose(0, 3, 1, 2)


# Pure-JAX reference for verification.
def single_conv_reference(x_nchw, weight, bias, gamma, beta):
    conv = lax.conv_general_dilated(
        x_nchw, weight, window_strides=(1, 1), padding=((1, 1), (1, 1)),
        dimension_numbers=("NCHW", "OIHW", "NCHW"))
    conv = conv + bias.reshape(1, -1, 1, 1)
    mean = jnp.mean(conv, axis=(0, 2, 3), keepdims=True)
    var = jnp.mean((conv - mean) ** 2, axis=(0, 2, 3), keepdims=True)
    y = (conv - mean) * lax.rsqrt(var + BN_EPS)
    y = y * gamma.reshape(1, -1, 1, 1) + beta.reshape(1, -1, 1, 1)
    return jnp.maximum(y, 0.0)


if __name__ == "__main__":
    key = jax.random.PRNGKey(0)
    k_x, k_w, k_b, k_g, k_be = jax.random.split(key, 5)

    N, Cin, Cout, H, W = 2, 4, 8, 16, 16
    x = jax.random.normal(k_x, (N, Cin, H, W), jnp.float32)
    weight = jax.random.normal(k_w, (Cout, Cin, 3, 3), jnp.float32) * 0.1
    bias = jax.random.normal(k_b, (Cout,), jnp.float32) * 0.1
    gamma = 1.0 + 0.1 * jax.random.normal(k_g, (Cout,), jnp.float32)
    beta = 0.1 * jax.random.normal(k_be, (Cout,), jnp.float32)

    out = jax.block_until_ready(single_conv_forward(x, weight, bias, gamma, beta))
    ref = jax.block_until_ready(single_conv_reference(x, weight, bias, gamma, beta))

    assert out.shape == (N, Cout, H, W), out.shape
    assert jnp.allclose(out, ref, atol=1e-4, rtol=1e-4), float(jnp.abs(out - ref).max())
    print("KERNEL_OK")
</pallas_src>

<mosaic_0001>
module attributes {stable_mosaic.version = 11 : i64} {
  func.func @fused_conv_bn_relu_kernel(%arg0: memref<2x18x64xf32, #tpu.memory_space<vmem>>, %arg1: memref<3x64x128xf32, #tpu.memory_space<vmem>>, %arg2: memref<1x128xf32, #tpu.memory_space<vmem>>, %arg3: memref<1x8xf32, #tpu.memory_space<vmem>>, %arg4: memref<1x8xf32, #tpu.memory_space<vmem>>, %arg5: memref<128x8xf32, #tpu.memory_space<vmem>>, %arg6: memref<8x128xf32, #tpu.memory_space<vmem>>, %arg7: memref<32x128xf32, #tpu.memory_space<vmem>>) attributes {dimension_semantics = [], scalar_prefetch = 0 : i64, scratch_operands = 0 : i64, tpu.core_type = #tpu.core_type<tc>} {
    %c0 = arith.constant 0 : index
    %c0_0 = arith.constant 0 : index
    %c0_1 = arith.constant 0 : index
    %0 = vector.load %arg0[%c0, %c0_0, %c0_1] : memref<2x18x64xf32, #tpu.memory_space<vmem>>, vector<2x18x64xf32>
    %cst = arith.constant 0.000000e+00 : f32
    %1 = vector.broadcast %cst : f32 to vector<32x128xf32>
    %2 = vector.extract_strided_slice %0 {offsets = [0, 0, 0], sizes = [2, 16, 64], strides = [1, 1, 1]} : vector<2x18x64xf32> to vector<2x16x64xf32>
    %3 = vector.shape_cast %2 : vector<2x16x64xf32> to vector<32x64xf32>
    %c0_2 = arith.constant 0 : index
    %c0_3 = arith.constant 0 : index
    %c0_4 = arith.constant 0 : index
    %4 = vector.load %arg1[%c0_2, %c0_3, %c0_4] : memref<3x64x128xf32, #tpu.memory_space<vmem>>, vector<1x64x128xf32>
    %5 = vector.shape_cast %4 : vector<1x64x128xf32> to vector<64x128xf32>
    %cst_5 = arith.constant dense<0.000000e+00> : vector<32x128xf32>
    %6 = tpu.matmul %3, %5, %cst_5 {dimension_numbers = #tpu.dot_dimension_numbers<[1], [0], [0], [1], [0, 0, 1, 1], [], []>} : vector<32x64xf32>, vector<64x128xf32>, vector<32x128xf32> -> vector<32x128xf32>
    %7 = arith.addf %1, %6 : vector<32x128xf32>
    %8 = vector.extract_strided_slice %0 {offsets = [0, 1, 0], sizes = [2, 16, 64], strides = [1, 1, 1]} : vector<2x18x64xf32> to vector<2x16x64xf32>
    %9 = vector.shape_cast %8 : vector<2x16x64xf32> to vector<32x64xf32>
    %c1 = arith.constant 1 : index
    %c0_6 = arith.constant 0 : index
    %c0_7 = arith.constant 0 : index
    %10 = vector.load %arg1[%c1, %c0_6, %c0_7] : memref<3x64x128xf32, #tpu.memory_space<vmem>>, vector<1x64x128xf32>
    %11 = vector.shape_cast %10 : vector<1x64x128xf32> to vector<64x128xf32>
    %cst_8 = arith.constant dense<0.000000e+00> : vector<32x128xf32>
    %12 = tpu.matmul %9, %11, %cst_8 {dimension_numbers = #tpu.dot_dimension_numbers<[1], [0], [0], [1], [0, 0, 1, 1], [], []>} : vector<32x64xf32>, vector<64x128xf32>, vector<32x128xf32> -> vector<32x128xf32>
    %13 = arith.addf %7, %12 : vector<32x128xf32>
    %14 = vector.extract_strided_slice %0 {offsets = [0, 2, 0], sizes = [2, 16, 64], strides = [1, 1, 1]} : vector<2x18x64xf32> to vector<2x16x64xf32>
    %15 = vector.shape_cast %14 : vector<2x16x64xf32> to vector<32x64xf32>
    %c2 = arith.constant 2 : index
    %c0_9 = arith.constant 0 : index
    %c0_10 = arith.constant 0 : index
    %16 = vector.load %arg1[%c2, %c0_9, %c0_10] : memref<3x64x128xf32, #tpu.memory_space<vmem>>, vector<1x64x128xf32>
    %17 = vector.shape_cast %16 : vector<1x64x128xf32> to vector<64x128xf32>
    %cst_11 = arith.constant dense<0.000000e+00> : vector<32x128xf32>
    %18 = tpu.matmul %15, %17, %cst_11 {dimension_numbers = #tpu.dot_dimension_numbers<[1], [0], [0], [1], [0, 0, 1, 1], [], []>} : vector<32x64xf32>, vector<64x128xf32>, vector<32x128xf32> -> vector<32x128xf32>
    %19 = arith.addf %13, %18 : vector<32x128xf32>
    %c0_12 = arith.constant 0 : index
    %c0_13 = arith.constant 0 : index
    %20 = vector.load %arg2[%c0_12, %c0_13] : memref<1x128xf32, #tpu.memory_space<vmem>>, vector<1x128xf32>
    %21 = vector.broadcast %20 : vector<1x128xf32> to vector<32x128xf32>
    %22 = arith.addf %19, %21 : vector<32x128xf32>
    %cst_14 = arith.constant dense<0.000000e+00> : vector<128xf32>
    %23 = vector.multi_reduction <add>, %22, %cst_14 [0] : vector<32x128xf32> to vector<128xf32>
    %24 = vector.shape_cast %23 : vector<128xf32> to vector<1x128xf32>
    %c0_15 = arith.constant 0 : index
    %c0_16 = arith.constant 0 : index
    %25 = vector.load %arg5[%c0_15, %c0_16] : memref<128x8xf32, #tpu.memory_space<vmem>>, vector<128x8xf32>
    %cst_17 = arith.constant dense<0.000000e+00> : vector<1x8xf32>
    %26 = tpu.matmul %24, %25, %cst_17 {dimension_numbers = #tpu.dot_dimension_numbers<[1], [0], [0], [1], [0, 0, 1, 1], [], []>} : vector<1x128xf32>, vector<128x8xf32>, vector<1x8xf32> -> vector<1x8xf32>
    %cst_18 = arith.constant 0.001953125 : f32
    %27 = vector.broadcast %cst_18 : f32 to vector<1x8xf32>
    %28 = arith.mulf %26, %27 : vector<1x8xf32>
    %c0_19 = arith.constant 0 : index
    %c0_20 = arith.constant 0 : index
    %29 = vector.load %arg6[%c0_19, %c0_20] : memref<8x128xf32, #tpu.memory_space<vmem>>, vector<8x128xf32>
    %cst_21 = arith.constant dense<0.000000e+00> : vector<1x128xf32>
    %30 = tpu.matmul %28, %29, %cst_21 {dimension_numbers = #tpu.dot_dimension_numbers<[1], [0], [0], [1], [0, 0, 1, 1], [], []>} : vector<1x8xf32>, vector<8x128xf32>, vector<1x128xf32> -> vector<1x128xf32>
    %31 = vector.broadcast %30 : vector<1x128xf32> to vector<32x128xf32>
    %32 = arith.subf %22, %31 : vector<32x128xf32>
    %33 = arith.mulf %32, %32 : vector<32x128xf32>
    %cst_22 = arith.constant dense<0.000000e+00> : vector<128xf32>
    %34 = vector.multi_reduction <add>, %33, %cst_22 [0] : vector<32x128xf32> to vector<128xf32>
    %35 = vector.shape_cast %34 : vector<128xf32> to vector<1x128xf32>
    %c0_23 = arith.constant 0 : index
    %c0_24 = arith.constant 0 : index
    %36 = vector.load %arg5[%c0_23, %c0_24] : memref<128x8xf32, #tpu.memory_space<vmem>>, vector<128x8xf32>
    %cst_25 = arith.constant dense<0.000000e+00> : vector<1x8xf32>
    %37 = tpu.matmul %35, %36, %cst_25 {dimension_numbers = #tpu.dot_dimension_numbers<[1], [0], [0], [1], [0, 0, 1, 1], [], []>} : vector<1x128xf32>, vector<128x8xf32>, vector<1x8xf32> -> vector<1x8xf32>
    %cst_26 = arith.constant 0.001953125 : f32
    %38 = vector.broadcast %cst_26 : f32 to vector<1x8xf32>
    %39 = arith.mulf %37, %38 : vector<1x8xf32>
    %cst_27 = arith.constant 9.99999974E-6 : f32
    %40 = vector.broadcast %cst_27 : f32 to vector<1x8xf32>
    %41 = arith.addf %39, %40 : vector<1x8xf32>
    %42 = math.rsqrt %41 : vector<1x8xf32>
    %c0_28 = arith.constant 0 : index
    %c0_29 = arith.constant 0 : index
    %43 = vector.load %arg3[%c0_28, %c0_29] : memref<1x8xf32, #tpu.memory_space<vmem>>, vector<1x8xf32>
    %44 = arith.mulf %43, %42 : vector<1x8xf32>
    %c0_30 = arith.constant 0 : index
    %c0_31 = arith.constant 0 : index
    %45 = vector.load %arg4[%c0_30, %c0_31] : memref<1x8xf32, #tpu.memory_space<vmem>>, vector<1x8xf32>
    %46 = arith.mulf %28, %44 : vector<1x8xf32>
    %47 = arith.subf %45, %46 : vector<1x8xf32>
    %c0_32 = arith.constant 0 : index
    %c0_33 = arith.constant 0 : index
    %48 = vector.load %arg6[%c0_32, %c0_33] : memref<8x128xf32, #tpu.memory_space<vmem>>, vector<8x128xf32>
    %cst_34 = arith.constant dense<0.000000e+00> : vector<1x128xf32>
    %49 = tpu.matmul %44, %48, %cst_34 {dimension_numbers = #tpu.dot_dimension_numbers<[1], [0], [0], [1], [0, 0, 1, 1], [], []>} : vector<1x8xf32>, vector<8x128xf32>, vector<1x128xf32> -> vector<1x128xf32>
    %c0_35 = arith.constant 0 : index
    %c0_36 = arith.constant 0 : index
    %50 = vector.load %arg6[%c0_35, %c0_36] : memref<8x128xf32, #tpu.memory_space<vmem>>, vector<8x128xf32>
    %cst_37 = arith.constant dense<0.000000e+00> : vector<1x128xf32>
    %51 = tpu.matmul %47, %50, %cst_37 {dimension_numbers = #tpu.dot_dimension_numbers<[1], [0], [0], [1], [0, 0, 1, 1], [], []>} : vector<1x8xf32>, vector<8x128xf32>, vector<1x128xf32> -> vector<1x128xf32>
    %52 = vector.broadcast %49 : vector<1x128xf32> to vector<32x128xf32>
    %53 = arith.mulf %22, %52 : vector<32x128xf32>
    %54 = vector.broadcast %51 : vector<1x128xf32> to vector<32x128xf32>
    %55 = arith.addf %53, %54 : vector<32x128xf32>
    %cst_38 = arith.constant 0.000000e+00 : f32
    %56 = vector.broadcast %cst_38 : f32 to vector<32x128xf32>
    %57 = arith.maximumf %55, %56 : vector<32x128xf32>
    %c0_39 = arith.constant 0 : index
    %c0_40 = arith.constant 0 : index
    %58 = vector.load %arg7[%c0_39, %c0_40] : memref<32x128xf32, #tpu.memory_space<vmem>>, vector<32x128xf32>
    tpu.vector_store %arg7[%c0_39, %c0_40], %57 {strides = array<i32>} : memref<32x128xf32, #tpu.memory_space<vmem>>, vector<32x128xf32>,
    return
  }
}

</mosaic_0001>

<bundles_post_ra>
// kernel: tpu_custom_call.1
= control target key start
LH: loop header
LB: loop body
LE: loop exit
PB: predicated region body
PF: predicated region fallthrough
CT: control target
= control target key end

     0   :  { %v1233_v9 = vmov 0.0|0.0   ;;  %vm47_vm0 = vcmask 1046528   ;;  %vm67_vm1 = vcmask 523264   ;;  %s1554_s0 = inlined_call_operand.vmem [shape: f32[2,18,64], index: 0, kind: input, shape index: {}]   ;;  %s1555_s1 = inlined_call_operand.vmem [shape: f32[3,64,128], index: 1, kind: input, shape index: {}]   ;;  %s1556_s2 = inlined_call_operand.vmem [shape: f32[1,128], index: 2, kind: input, shape index: {}]   ;;  %s1557_s3 = inlined_call_operand.vmem [shape: f32[1,8], index: 3, kind: input, shape index: {}]   ;;  %s1558_s4 = inlined_call_operand.vmem [shape: f32[1,8], index: 4, kind: input, shape index: {}]   ;;  %s1559_s5 = inlined_call_operand.vmem [shape: f32[128,8], index: 5, kind: input, shape index: {}]   ;;  %s1560_s6 = inlined_call_operand.vmem [shape: f32[8,128], index: 6, kind: input, shape index: {}]   ;;  %s1561_s7 = inlined_call_operand.hbm [shape: f32[32,128], index: 7, kind: output, shape index: {}]  }
   0x1   :  { %v838_v0 = vld [vmem:[%s1555_s1 + $0x40] sm:$0xff]  ;;  %v839_v1 = vld [vmem:[%s1555_s1 + $0x48] sm:$0xff]  ;;  %v840_v2 = vld [vmem:[%s1555_s1 + $0x50] sm:$0xff]  ;;  %1145 = vmatprep.subr.bf16.mxu1 %v1233_v9 }
   0x2   :  { %v1097_v3 = vpack.c.bf16 %v839_v1, %v838_v0  ;;  %v841_v4 = vld [vmem:[%s1555_s1 + $0x58] sm:$0xff]  ;;  %v842_v6 = vld [vmem:[%s1555_s1 + $0x60] sm:$0xff]  ;;  %v843_v7 = vld [vmem:[%s1555_s1 + $0x68] sm:$0xff] }
   0x3   :  { %v1101_v5 = vpack.c.bf16 %v841_v4, %v840_v2  ;;  %v1300_v8 = vld [vmem:[%s1554_s0] sm:$0xff]  ;;  %v1306_v10 = vld [vmem:[%s1554_s0 + $0x8] sm:$0xff]  ;;  %v1105_v13 = vpack.c.bf16 %v843_v7, %v842_v6  ;;  %v844_v14 = vld [vmem:[%s1555_s1 + $0x70] sm:$0xff] }
   0x4   :  { %1098 = vmatprep.subr.bf16.mxu0 %v1097_v3  ;;  %v48_v11 = vrot.slane %v1300_v8, 1  ;;  %v49_v12 = vrot.slane %v1306_v10, 1  ;;  %v845_v15 = vld [vmem:[%s1555_s1 + $0x78] sm:$0xff]  ;;  %v33_v17 = vld [vmem:[%s1555_s1] sm:$0xff]  ;;  %v34_v18 = vld [vmem:[%s1555_s1 + $0x8] sm:$0xff] }
   0x5   :  { %1100 = vmatpush3.bf16.msra.mxu0 %v1097_v3  ;;  %v1109_v19 = vpack.c.bf16 %v845_v15, %v844_v14  ;;  %v1327_v20 = vld [vmem:[%s1554_s0 + $0x10] sm:$0x3]  ;;  %v1332_v21 = vld [vmem:[%s1554_s0 + $0x18] sm:$0xff]  ;;  %v1337_v22 = vld [vmem:[%s1554_s0 + $0x20] sm:$0xff] }
   0x6   :  { %1102 = vmatprep.subr.bf16.mxu0 %v1101_v5  ;;  %v50_v16 = vsel %vm47_vm0, %v48_v11, %v49_v12  ;;  %v391_v23 = vld [vmem:[%s1559_s5] sm:$0xff]  ;;  %v392_v24 = vld [vmem:[%s1559_s5 + $0x8] sm:$0xff]  ;;  %v393_v25 = vld [vmem:[%s1559_s5 + $0x10] sm:$0xff] }
   0x7   :  { %962 = vmatprep.mubr.msk.f32.mxu0 %vm67_vm1, %v50_v16  ;;  %v1348_v26 = vpack.c.bf16 %v392_v24, %v391_v23  ;;  %v394_v27 = vld [vmem:[%s1559_s5 + $0x18] sm:$0xff] }
   0x9   :  { %1104 = vmatpush3.bf16.msra.mxu0 %v1101_v5 }
   0xa   :  { %1106 = vmatprep.subr.bf16.mxu0 %v1105_v13 }
   0xb   :  { %12 = vsyncpa [#allocation3], 0  ;;  %v51_v28 = vrot.slane %v1327_v20, 1  ;;  %v1113_v29 = vpack.c.bf16 %v34_v18, %v33_v17  ;;  %v53_v30 = vrot.slane %v1332_v21, 1  ;;  %v54_v31 = vrot.slane %v1337_v22, 1  ;;  %1147 = vmatpush3.bf16.msra.mxu1 %v1348_v26  ;;  %v35_v34 = vld [vmem:[%s1555_s1 + $0x10] sm:$0xff] }
   0xc   :  { %v1359_v32 = vld [vmem:[%s1554_s0 + $0x28] sm:$0x3]  ;;  %v1362_v33 = vpack.c.bf16 %v394_v27, %v393_v25  ;;  %v36_v35 = vld [vmem:[%s1555_s1 + $0x18] sm:$0xff]  ;;  %1148 = vmatprep.subr.bf16.mxu1 %v1233_v9  ;;  %v37_v40 = vld [vmem:[%s1555_s1 + $0x20] sm:$0xff]  ;;  %v255_v53 = vrot.slane %v1300_v8, 2  ;;  %v256_v54 = vrot.slane %v1306_v10, 2 }
   0xd   :  { %1108 = vmatpush3.bf16.msra.mxu0 %v1105_v13  ;;  %v52_v36 = vsel %vm47_vm0, %v49_v12, %v51_v28  ;;  %v56_v37 = vrot.slane %v1359_v32, 1  ;;  %v1117_v38 = vpack.c.bf16 %v36_v35, %v35_v34  ;;  %v55_v39 = vsel %vm47_vm0, %v53_v30, %v54_v31  ;;  %v38_v41 = vld [vmem:[%s1555_s1 + $0x28] sm:$0xff]  ;;  %v39_v44 = vld [vmem:[%s1555_s1 + $0x30] sm:$0xff]  ;;  %v40_v45 = vld [vmem:[%s1555_s1 + $0x38] sm:$0xff] }
   0xe   :  { %1110 = vmatprep.subr.bf16.mxu0 %v1109_v19  ;;  %v1121_v43 = vpack.c.bf16 %v38_v41, %v37_v40  ;;  %v1125_v46 = vpack.c.bf16 %v40_v45, %v39_v44  ;;  %v854_v47 = vld [vmem:[%s1555_s1 + $0x80] sm:$0xff]  ;;  %v855_v48 = vld [vmem:[%s1555_s1 + $0x88] sm:$0xff]  ;;  %v856_v50 = vld [vmem:[%s1555_s1 + $0x90] sm:$0xff]  ;;  %vm254_vm2 = vcmask 1045504   ;;  %v258_v62 = vrot.slane %v1327_v20, 2 }
   0xf   :  { %1150 = vmatpush3.bf16.msra.mxu1 %v1362_v33  ;;  %v57_v42 = vsel %vm47_vm0, %v54_v31, %v56_v37  ;;  %v1129_v49 = vpack.c.bf16 %v855_v48, %v854_v47  ;;  %v857_v51 = vld [vmem:[%s1555_s1 + $0x98] sm:$0xff]  ;;  %v858_v55 = vld [vmem:[%s1555_s1 + $0xa0] sm:$0xff]  ;;  %v859_v56 = vld [vmem:[%s1555_s1 + $0xa8] sm:$0xff]  ;;  %v257_v58 = vsel %vm254_vm2, %v255_v53, %v256_v54  ;;  %v260_v63 = vrot.slane %v1332_v21, 2 }
  0x10   :  { %1151 = vmatprep.subr.bf16.mxu1 %v1233_v9  ;;  %v1133_v52 = vpack.c.bf16 %v857_v51, %v856_v50  ;;  %v1137_v57 = vpack.c.bf16 %v859_v56, %v858_v55  ;;  %v860_v59 = vld [vmem:[%s1555_s1 + $0xb0] sm:$0xff]  ;;  %v861_v60 = vld [vmem:[%s1555_s1 + $0xb8] sm:$0xff]  ;;  %v261_v0 = vrot.slane %v1337_v22, 2  ;;  %v259_v1 = vsel %vm254_vm2, %v256_v54, %v258_v62  ;;  %v395_v5 = vld [vmem:[%s1559_s5 + $0x20] sm:$0xff] }
  0x11   :  { %1112 = vmatpush3.bf16.msra.mxu0 %v1109_v19  ;;  %v1141_v61 = vpack.c.bf16 %v861_v60, %v860_v59  ;;  %v263_v2 = vrot.slane %v1359_v32, 2  ;;  %v396_v6 = vld [vmem:[%s1559_s5 + $0x28] sm:$0xff]  ;;  %v399_v12 = vld [vmem:[%s1559_s5 + $0x40] sm:$0xff]  ;;  %v401_v15 = vld [vmem:[%s1559_s5 + $0x50] sm:$0xff]  ;;  %vm1234_vm3 = vmmov 0   ;;  %vm479_vm4 = vcmask 64512  }
  0x12   :  { %1114 = vmatprep.subr.bf16.mxu0 %v1113_v29  ;;  %v262_v3 = vsel %vm254_vm2, %v260_v63, %v261_v0  ;;  %v1152_v7 = vpack.c.bf16 %v396_v6, %v395_v5  ;;  %v400_v13 = vld [vmem:[%s1559_s5 + $0x48] sm:$0xff]  ;;  %v402_v16 = vld [vmem:[%s1559_s5 + $0x58] sm:$0xff]  ;;  %v403_v18 = vld [vmem:[%s1559_s5 + $0x60] sm:$0xff]  ;;  %v553_v47 = vlaneseq }
  0x13   :  { %v264_v4 = vsel %vm254_vm2, %v261_v0, %v263_v2  ;;  %v1158_v14 = vpack.c.bf16 %v400_v13, %v399_v12  ;;  %v1161_v17 = vpack.c.bf16 %v402_v16, %v401_v15  ;;  %v404_v19 = vld [vmem:[%s1559_s5 + $0x68] sm:$0xff]  ;;  %v406_v23 = vld [vmem:[%s1559_s5 + $0x78] sm:$0xff]  ;;  %v1488_v25 = vld [vmem:[%s1560_s6] sm:$0xff] }
  0x14   :  { %963 = vmatmul.mubr.msk.f32.vlgmr.msra.gmra.mrb[0].mxu0 %vm67_vm1, %v52_v36  ;;  %1153 = vmatpush3.bf16.msra.mxu1 %v1152_v7  ;;  %v1164_v20 = vpack.c.bf16 %v404_v19, %v403_v18  ;;  %v866_v27 = vld [vmem:[%s1556_s2] ss:$0 sm:$0xff]  ;;  %v554_v48 = vshrl.u32 %v553_v47, 7 }
  0x15   :  { %1116 = vmatpush3.bf16.msra.mxu0 %v1113_v29  ;;  %965 = vmatprep.mubr.msk.f32.mxu0 %vm67_vm1, %v55_v39  ;;  %v649_v13 = vld [vmem:[%s1558_s4] sm:$0x1] }
  0x16   :  { %1118 = vmatprep.subr.bf16.mxu0 %v1117_v38  ;;  %1154 = vmatprep.subr.bf16.mxu1 %v1233_v9 }
  0x18   :  { %966 = vmatmul.mubr.msk.f32.gmra.mrb[2].mxu0 %vm67_vm1, %v57_v42 }
  0x19   :  { %1120 = vmatpush3.bf16.msra.mxu0 %v1117_v38  ;;  %984 = vmatprep.mubr.msk.f32.mxu0 %vm67_vm1, %v1300_v8  ;;  %v397_v8 = vld [vmem:[%s1559_s5 + $0x30] sm:$0xff] }
  0x1a   :  { %1122 = vmatprep.subr.bf16.mxu0 %v1121_v43 }
  0x1d   :  { %1124 = vmatpush3.bf16.msra.mxu0 %v1121_v43 }
  0x1e   :  { %1126 = vmatprep.subr.bf16.mxu0 %v1125_v46 }
  0x21   :  { %1128 = vmatpush3.bf16.msra.mxu0 %v1125_v46 }
  0x22   :  { %1130 = vmatprep.subr.bf16.mxu0 %v1129_v49 }
  0x24   :  { %985 = vmatmul.mubr.msk.f32.vlgmr.msra.gmra.mrb[0].mxu0 %vm67_vm1, %v1306_v10  ;;  %v398_v10 = vld [vmem:[%s1559_s5 + $0x38] sm:$0xff] }
  0x25   :  { %1132 = vmatpush3.bf16.msra.mxu0 %v1129_v49  ;;  %987 = vmatprep.mubr.msk.f32.mxu0 %vm67_vm1, %v1332_v21  ;;  %v1155_v11 = vpack.c.bf16 %v398_v10, %v397_v8  ;;  %v1235_v21 = vmov 0.0   ;;  %v555_v49 = vsub.s32 0, %v554_v48  ;;  %v647_v10 = vld [vmem:[%s1557_s3] sm:$0x1]  ;;  %s1236_s3 = smov [#allocation2]  }
  0x26   :  { %1134 = vmatprep.subr.bf16.mxu0 %v1133_v52  ;;  %1044 = vmatprep.mubr.msk.f32.mxu1 %vm1234_vm3, %v1235_v21  ;;  %s827_s4 = sshll.u32 %s1236_s3, 4  ;;  %s828_s4 = int_to_ptr.vmem [resolvable:$true] %s827_s4 }
  0x27   :  { %1156 = vmatpush3.bf16.msra.mxu1 %v1155_v11  ;;  %s1209_s24 = scalar_lea.vmem %s828_s4, 512  ;;  %p1214_p1 = scmp.lt.s32.totalorder %s828_s4, %s828_s4 }
  0x28   :  { %988 = vmatmul.mubr.msk.f32.gmra.mrb[2].mxu0 %vm67_vm1, %v1337_v22  ;;  %1157 = vmatprep.subr.bf16.mxu1 %v1233_v9  ;;  %v405_v22 = vld [vmem:[%s1559_s5 + $0x70] sm:$0xff]  ;;  %p1210_p0 = scmp.ne.s32.totalorder %s828_s4, %s1209_s24  ;;  %p1215_p2 = scmp.lt.s32.totalorder %s1209_s24, %s1209_s24 }
  0x29   :  { %1136 = vmatpush3.bf16.msra.mxu0 %v1133_v52  ;;  %1006 = vmatprep.mubr.msk.f32.mxu0 %vm67_vm1, %v257_v58  ;;  %v1167_v24 = vpack.c.bf16 %v406_v23, %v405_v22 }
  0x2a   :  { %1138 = vmatprep.subr.bf16.mxu0 %v1137_v57  ;;  %p1216_p3 = por %p1215_p2, %p1214_p1 }
  0x2b   :  { %1159 = vmatpush3.bf16.msra.mxu1 %v1158_v14 }
  0x2c   :  { %1160 = vmatprep.subr.bf16.mxu1 %v1233_v9  ;;  %p1217_p4 = pnand %p1216_p3, %p1210_p0 }
  0x2d   :  { %1140 = vmatpush3.bf16.msra.mxu0 %v1137_v57 }
  0x2e   :  { %1142 = vmatprep.subr.bf16.mxu0 %v1141_v61 }
  0x2f   :  { %1162 = vmatpush3.bf16.msra.mxu1 %v1161_v17 }
  0x30   :  { %1163 = vmatprep.subr.bf16.mxu1 %v1233_v9 }
  0x31   :  { %1144 = vmatpush3.bf16.msra.mxu0 %v1141_v61 }
  0x32   :  { %1047 = vmatprep.subr.mxu0 %v1235_v21 }
  0x33   :  { %1165 = vmatpush3.bf16.msra.mxu1 %v1164_v20 }
  0x34   :  { %1007 = vmatmul.mubr.msk.f32.vlgmr.msra.gmra.mrb[0].mxu0 %vm67_vm1, %v259_v1  ;;  %1166 = vmatprep.subr.bf16.mxu1 %v1233_v9 }
  0x35   :  { %1009 = vmatprep.mubr.msk.f32.mxu0 %vm67_vm1, %v262_v3  ;;  %1048 = vmatpush3.msra.mxu0 %v1488_v25 }
  0x36   :  { %1087 = vmatprep.subr.mxu0 %v1235_v21 }
  0x37   :  { %1168 = vmatpush3.bf16.msra.mxu1 %v1167_v24 }
  0x38   :  { %1010 = vmatmul.mubr.msk.f32.gmra.mrb[2].mxu0 %vm67_vm1, %v264_v4  ;;  %1169 = vmatprep.subr.bf16.mxu1 %v1233_v9 }
  0x39   :  { %1049 = vmatprep.mubr.msk.f32.mxu0 %vm1234_vm3, %v1235_v21 }
 0x107   :  { %v1008_v28 = vpop.f32.mrb[0].mxu0 }
 0x108   :  { %v348_v29 = vpop.f32.mrb[1].mxu0  ;;  %v1495_v30 = vadd.f32 %v1008_v28, %v866_v27 }
 0x109   :  { %v1497_v31 = vadd.f32 %v866_v27, %v348_v29 }
 0x10b   :  { %v1011_v32 = vpop.f32.mrb[2].mxu0  ;;  %v382_v35 = vadd.f32 %v1495_v30, %v1497_v31 }
 0x10c   :  { %v358_v34 = vpop.f32.mrb[3].mxu0  ;;  %v1503_v37 = vadd.f32 %v1011_v32, %v866_v27 }
 0x10d   :  { %v1501_v36 = vadd.f32 %v866_v27, %v358_v34 }
 0x10f   :  { %v383_v38 = vadd.f32 %v382_v35, %v1501_v36 }
 0x111   :  { %v384_v39 = vadd.f32 %v383_v38, %v1503_v37 }
 0x113   :  { %v385_v40 = vrot.slane %v384_v39, 4 }
 0x115   :  { %v386_v41 = vadd.f32 %v385_v40, %v384_v39 }
 0x117   :  { %v387_v42 = vrot.slane %v386_v41, 2 }
 0x119   :  { %v388_v43 = vadd.f32 %v387_v42, %v386_v41 }
 0x11b   :  { %v389_v44 = vrot.slane %v388_v43, 1 }
 0x11d   :  { %v390_v45 = vadd.f32 %v389_v44, %v388_v43 }
 0x11f   :  { %1045 = vmatmul.mubr.f32.vlgmr.msra.gmra.mrb[0].mxu1 %v390_v45 }
 0x120   :  { %1171 = vmatpush3.bf16.msra.mxu1 %v1348_v26  ;;  %1084 = vmatprep.mubr.msk.f32.mxu1 %vm1234_vm3, %v1235_v21 }
 0x121   :  { %1172 = vmatprep.subr.bf16.mxu1 %v1233_v9 }
 0x124   :  { %1174 = vmatpush3.bf16.msra.mxu1 %v1362_v33 }
 0x125   :  { %1175 = vmatprep.subr.bf16.mxu1 %v1233_v9 }
 0x128   :  { %1177 = vmatpush3.bf16.msra.mxu1 %v1152_v7 }
 0x129   :  { %1178 = vmatprep.subr.bf16.mxu1 %v1233_v9 }
 0x12c   :  { %1180 = vmatpush3.bf16.msra.mxu1 %v1155_v11 }
 0x12d   :  { %1181 = vmatprep.subr.bf16.mxu1 %v1233_v9 }
 0x130   :  { %1183 = vmatpush3.bf16.msra.mxu1 %v1158_v14 }
 0x131   :  { %1184 = vmatprep.subr.bf16.mxu1 %v1233_v9 }
 0x134   :  { %1186 = vmatpush3.bf16.msra.mxu1 %v1161_v17 }
 0x135   :  { %1187 = vmatprep.subr.bf16.mxu1 %v1233_v9 }
 0x138   :  { %1189 = vmatpush3.bf16.msra.mxu1 %v1164_v20 }
 0x139   :  { %1190 = vmatprep.subr.bf16.mxu1 %v1233_v9 }
 0x13c   :  { %1192 = vmatpush3.bf16.msra.mxu1 %v1167_v24 }
 0x1f2   :  { %v473_v26 = vpop.f32.mrb[0].mxu1 }
 0x1f3   :  { %v477_v33 = vmul.f32 0.001953125, %v473_v26  ;;  %v1046_v46 = vpop.f32.mrb[1].mxu1 }
 0x1f5   :  { %1050 = vmatmul.mubr.msk.f32.vlgmr.msra.gmra.mrb[4].mxu0 %vm479_vm4, %v477_v33 }
 0x1f6   :  { %1088 = vmatpush3.msra.mxu0 %v1488_v25  ;;  %1089 = vmatprep.mubr.msk.f32.mxu0 %vm1234_vm3, %v1235_v21 }
 0x1f7   :  { %1092 = vmatprep.subr.mxu0 %v1235_v21 }
 0x2c8   :  { %v549_v50 = vpop.f32.mrb[4].mxu0 }
 0x2c9   :  { %v556_v51 = vrot.slane %v549_v50, %v555_v49  ;;  %v1051_v9 = vpop.f32.mrb[5].mxu0 }
 0x2cb   :  { %v557_v52 = vsub.f32 %v1497_v31, %v556_v51  ;;  %v558_v53 = vsub.f32 %v1495_v30, %v556_v51  ;;  %v559_v54 = vsub.f32 %v1501_v36, %v556_v51  ;;  %v560_v55 = vsub.f32 %v1503_v37, %v556_v51 }
 0x2cd   :  { %v561_v56 = vmul.f32 %v557_v52, %v557_v52  ;;  %v562_v57 = vmul.f32 %v558_v53, %v558_v53  ;;  %v563_v58 = vmul.f32 %v559_v54, %v559_v54  ;;  %v564_v60 = vmul.f32 %v560_v55, %v560_v55 }
 0x2cf   :  { %v565_v59 = vadd.f32 %v562_v57, %v561_v56 }
 0x2d1   :  { %v566_v61 = vadd.f32 %v565_v59, %v563_v58 }
 0x2d3   :  { %v567_v62 = vadd.f32 %v566_v61, %v564_v60 }
 0x2d5   :  { %v568_v63 = vrot.slane %v567_v62, 4 }
 0x2d7   :  { %v569_v0 = vadd.f32 %v568_v63, %v567_v62 }
 0x2d9   :  { %v570_v1 = vrot.slane %v569_v0, 2 }
 0x2db   :  { %v571_v2 = vadd.f32 %v570_v1, %v569_v0 }
 0x2dd   :  { %v572_v3 = vrot.slane %v571_v2, 1 }
 0x2df   :  { %v573_v4 = vadd.f32 %v572_v3, %v571_v2 }
 0x2e1   :  { %1085 = vmatmul.mubr.f32.vlgmr.msra.gmra.mrb[2].mxu1 %v573_v4 }
 0x3b4   :  { %v640_v5 = vpop.f32.mrb[2].mxu1 }
 0x3b5   :  { %v644_v6 = vmul.f32 0.001953125, %v640_v5  ;;  %v1086_v7 = vpop.f32.mrb[3].mxu1 }
 0x3b7   :  { %v645_v8 = vadd.f32 1e-05, %v644_v6 }
 0x3b9   :  { %1207 = vrsqrt.f32 %v645_v8 }
 0x3c3   :  { %v1208_v11 = vpop.eup %1207 }
 0x3c4   :  { %v648_v12 = vmul.f32 %v1208_v11, %v647_v10 }
 0x3c6   :  { %1090 = vmatmul.mubr.msk.f32.vlgmr.msra.gmra.mrb[6].mxu0 %vm479_vm4, %v648_v12  ;;  %v650_v14 = vmul.f32 %v648_v12, %v477_v33 }
 0x3c7   :  { %1093 = vmatpush3.msra.mxu0 %v1488_v25  ;;  %1094 = vmatprep.mubr.msk.f32.mxu0 %vm1234_vm3, %v1235_v21 }
 0x3c8   :  { %v651_v15 = vsub.f32 %v649_v13, %v650_v14 }
 0x3ca   :  { %1095 = vmatmul.mubr.msk.f32.vlgmr.msra.gmra.mrb[8].mxu0 %vm479_vm4, %v651_v15 }
 0x499   :  { %v721_v16 = vpop.f32.mrb[6].mxu0 }
 0x49a   :  { %v801_v17 = vrot.slane %v721_v16, %v555_v49  ;;  %v1091_v18 = vpop.f32.mrb[7].mxu0 }
 0x49c   :  { %v802_v19 = vmul.f32 %v801_v17, %v1497_v31  ;;  %v803_v22 = vmul.f32 %v801_v17, %v1495_v30  ;;  %v804_v23 = vmul.f32 %v801_v17, %v1501_v36  ;;  %v805_v24 = vmul.f32 %v801_v17, %v1503_v37 }
 0x49d   :  { %v794_v20 = vpop.f32.mrb[8].mxu0 }
 0x49e   :  { %v809_v27 = vrot.slane %v794_v20, %v555_v49  ;;  %v1096_v25 = vpop.f32.mrb[9].mxu0 }
 0x4a0   :  { %v810_v21 = vadd.f32 %v809_v27, %v802_v19  ;;  %v811_v28 = vadd.f32 %v809_v27, %v803_v22  ;;  %v812_v29 = vadd.f32 %v809_v27, %v804_v23  ;;  %v813_v32 = vadd.f32 %v809_v27, %v805_v24 }
 0x4a2   :  { %v814_v34 = vmax.f32 %v810_v21, 0.0  ;;  %v815_v35 = vmax.f32 %v811_v28, 0.0  ;;  %v816_v38 = vmax.f32 %v812_v29, 0.0  ;;  %v817_v31 = vmax.f32 %v813_v32, 0.0 }
 0x4a4   :  { %818 = vst [vmem:[#allocation2] sm:$0xff] %v814_v34  ;;  %819 = vst [vmem:[#allocation2 + $0x8] sm:$0xff] %v815_v35 }
 0x4a5   :  { %820 = vst [vmem:[#allocation2 + $0x10] sm:$0xff] %v816_v38  ;;  %821 = vst [vmem:[#allocation2 + $0x18] sm:$0xff] %v817_v31 }
 0x4a6   :  { %1220 = shalt.err (!%p1217_p4)
}
 0x4a7   :  { %s1221_s27 = scalar_lea.hbm %s1561_s7, 512 }
 0x4a8   :  { %p1222_p5 = scmp.ne.s32.totalorder %s1561_s7, %s1221_s27  ;;  %p1225_p6 = scmp.lt.u32.totalorder %s1221_s27, %s1561_s7 }
 0x4aa   :  { %p1227_p7 = pnand %p1225_p6, %p1222_p5 }
 0x4ac   :  { %1230 = shalt.err (!%p1227_p7)
}
 0x4ad   :  { %s1237_s9 = smov 128   ;;  %s1238_s10 = smov 8  }
 0x4ae   :  { %833 = dma.vmem_to_hbm [thread:$0]  %s828_s4, 512, %s1561_s7, [#allocation3], %s1237_s9, %s1237_s9, %s1238_s10  }
 0x4af   :  { %1231 = dma.done.wait [#allocation3], 512  }
 0x4b0   :  { %1232 = vsyncadd [#allocation3], 4294966784 }
 0x4b1   :  { %837 = vsyncpa [#allocation3], 1 }

</bundles_post_ra>
